<compile_context>
chip_gen: v7x
topology: tpu7x:2x2x1
jax: 0.10.0
libtpu: 0.0.40
codegen_flags: <defaults>
</compile_context>

<pallas_src>
import numpy as np
import jax
import jax.numpy as jnp
from jax.experimental import pallas as pl
from jax.experimental.pallas import tpu as pltpu

_MIB = 1 << 20


def _round_up(x, m):
    return (x + m - 1) // m * m


def _pad2d(a, rows, cols):
    r, c = a.shape
    if r == rows and c == cols:
        return a
    return jnp.pad(a, ((0, rows - r), (0, cols - c)))


# --------------------------------------------------------------------------
# Pass 1: z = x @ (sum A)^T   -- (M_pad, R_pad), K reduction, computed once.
# --------------------------------------------------------------------------
def _xa_kernel(x_ref, aT_ref, z_ref, acc_ref):
    # x: (tm, tk) bf16 ; aT: (tk, R_pad) bf16 ; z: (tm, R_pad) bf16 ; acc f32
    k = pl.program_id(1)

    @pl.when(k == 0)
    def _():
        acc_ref[...] = jnp.zeros_like(acc_ref)

    acc_ref[...] += jnp.dot(x_ref[...], aT_ref[...],
                            preferred_element_type=jnp.float32)

    @pl.when(k == pl.num_programs(1) - 1)
    def _():
        z_ref[...] = acc_ref[...].astype(z_ref.dtype)


# --------------------------------------------------------------------------
# Pass 2: out = x @ W_res^T + bias + z @ (scaling * sum B)^T
# --------------------------------------------------------------------------
def _cola_linear_kernel(x_ref, wT_ref, b_ref, z_ref, bT_ref, out_ref, acc_ref):
    # x: (tm, tk) bf16 ; wT: (tk, tn) bf16 ; b: (1, tn) f32 ;
    # z: (tm, R_pad) bf16 ; bT: (R_pad, tn) bf16 (scaling pre-folded) ; acc f32
    k = pl.program_id(2)

    @pl.when(k == 0)
    def _():
        acc_ref[...] = jnp.zeros_like(acc_ref)

    acc_ref[...] += jnp.dot(x_ref[...], wT_ref[...],
                            preferred_element_type=jnp.float32)

    @pl.when(k == pl.num_programs(2) - 1)
    def _():
        lora = jnp.dot(z_ref[...], bT_ref[...],
                       preferred_element_type=jnp.float32)
        out_ref[...] = (acc_ref[...] + b_ref[...] + lora).astype(out_ref.dtype)


# --------------------------------------------------------------------------
# Wrapper: one-time weight preparation + per-call kernel launch.
# --------------------------------------------------------------------------
def prepare_cola_weights(w_res, bias, a_sum, b_sum, scaling, *,
                         tn=1024, tk=1024, compute_dtype=jnp.bfloat16):
    """Transpose / pad / cast weights ONCE (hoist out of the per-call path).

    w_res: (out_f, in_f); bias: (out_f,) or None;
    a_sum: (r, in_f) == sum_i lora_A_i ; b_sum: (out_f, r) == sum_j lora_B_j.
    """
    out_f, in_f = w_res.shape
    r = a_sum.shape[0]

    tn = _round_up(max(128, min(tn, _round_up(out_f, 128))), 128)
    tk = _round_up(max(128, min(tk, _round_up(in_f, 128))), 128)
    N_pad = _round_up(out_f, tn)
    K_pad = _round_up(in_f, tk)
    R_pad = _round_up(max(r, 1), 128)

    wT_p = _pad2d(jnp.asarray(w_res).T, K_pad, N_pad).astype(compute_dtype)
    if bias is None:
        b_p = jnp.zeros((1, N_pad), jnp.float32)
    else:
        b_p = _pad2d(jnp.asarray(bias, jnp.float32).reshape(1, out_f), 1, N_pad)
    aT_p = _pad2d(jnp.asarray(a_sum).T, K_pad, R_pad).astype(compute_dtype)
    bT_p = _pad2d(float(scaling) * jnp.asarray(b_sum).T,
                  R_pad, N_pad).astype(compute_dtype)

    return dict(wT=wT_p, b=b_p, aT=aT_p, bT=bT_p,
                in_f=in_f, out_f=out_f, r=r,
                tn=tn, tk=tk, N_pad=N_pad, K_pad=K_pad, R_pad=R_pad,
                compute_dtype=compute_dtype)


def cola_linear_prepared(x, prep, *, tm=256, out_dtype=None):
    """Apply the CoLA Linear forward with pre-prepared (padded/bf16) weights."""
    in_f, out_f = prep["in_f"], prep["out_f"]
    tn, tk = prep["tn"], prep["tk"]
    N_pad, K_pad, R_pad = prep["N_pad"], prep["K_pad"], prep["R_pad"]
    cdt = prep["compute_dtype"]

    lead_shape = x.shape[:-1]
    x2d = x.reshape(-1, in_f)
    M = x2d.shape[0]
    out_dtype = x.dtype if out_dtype is None else out_dtype
    cb = jnp.dtype(cdt).itemsize
    ob = jnp.dtype(out_dtype).itemsize

    # bf16 packs two rows per sublane -> keep the M tile a multiple of 16.
    tm = _round_up(max(16, min(tm, _round_up(M, 16))), 16)

    # v7x-safe VMEM budget for the double-buffered working set (~26 MiB):
    # 2x each input block + 2x out block + f32 accumulator.
    def vmem_est(tm_):
        dbl = 2 * (tm_ * tk * cb + tk * tn * cb + tn * 4
                   + tm_ * R_pad * cb + R_pad * tn * cb + tm_ * tn * ob)
        return dbl + tm_ * tn * 4

    while vmem_est(tm) > 26 * _MIB and tm > 16:
        tm = max(16, _round_up(tm // 2, 16))
    vmem_limit = int(min(max(32 * _MIB, vmem_est(tm) + 4 * _MIB), 56 * _MIB))

    M_pad = _round_up(M, tm)
    x_p = _pad2d(x2d, M_pad, K_pad).astype(cdt)

    gm, gn, gk = M_pad // tm, N_pad // tn, K_pad // tk

    # ---- pass 1: LoRA intermediate z (hoisted out of the N-tile loop) ------
    z_cost = pl.CostEstimate(
        flops=2 * M_pad * K_pad * R_pad,
        transcendentals=0,
        bytes_accessed=int(M_pad * K_pad * cb + K_pad * R_pad * cb
                           + M_pad * R_pad * cb))
    z_p = pl.pallas_call(
        _xa_kernel,
        out_shape=jax.ShapeDtypeStruct((M_pad, R_pad), cdt),
        grid_spec=pltpu.PrefetchScalarGridSpec(
            num_scalar_prefetch=0,
            grid=(gm, gk),
            in_specs=[
                pl.BlockSpec((tm, tk), lambda i, k: (i, k)),       # x tile
                pl.BlockSpec((tk, R_pad), lambda i, k: (k, 0)),    # (sum A)^T
            ],
            out_specs=pl.BlockSpec((tm, R_pad), lambda i, k: (i, 0)),
            scratch_shapes=[pltpu.VMEM((tm, R_pad), jnp.float32)]),
        compiler_params=pltpu.CompilerParams(
            dimension_semantics=("parallel", "arbitrary"),
            vmem_limit_bytes=vmem_limit),
        cost_estimate=z_cost,
    )(x_p, prep["aT"])

    # ---- pass 2: base matmul + bias + LoRA finalize -------------------------
    main_cost = pl.CostEstimate(
        flops=2 * M_pad * N_pad * (K_pad + R_pad),
        transcendentals=0,
        bytes_accessed=int(M_pad * K_pad * cb + K_pad * N_pad * cb + N_pad * 4
                           + M_pad * R_pad * cb + R_pad * N_pad * cb
                           + M_pad * N_pad * ob))
    out_p = pl.pallas_call(
        _cola_linear_kernel,
        out_shape=jax.ShapeDtypeStruct((M_pad, N_pad), out_dtype),
        grid_spec=pltpu.PrefetchScalarGridSpec(
            num_scalar_prefetch=0,
            grid=(gm, gn, gk),
            in_specs=[
                pl.BlockSpec((tm, tk), lambda i, j, k: (i, k)),      # x tile
                pl.BlockSpec((tk, tn), lambda i, j, k: (k, j)),      # W_res^T
                pl.BlockSpec((1, tn), lambda i, j, k: (0, j)),       # bias f32
                pl.BlockSpec((tm, R_pad), lambda i, j, k: (i, 0)),   # z (pass 1)
                pl.BlockSpec((R_pad, tn), lambda i, j, k: (0, j)),   # scaled B^T
            ],
            out_specs=pl.BlockSpec((tm, tn), lambda i, j, k: (i, j)),
            scratch_shapes=[pltpu.VMEM((tm, tn), jnp.float32)]),
        compiler_params=pltpu.CompilerParams(
            dimension_semantics=("parallel", "parallel", "arbitrary"),
            vmem_limit_bytes=vmem_limit),
        cost_estimate=main_cost,
    )(x_p, prep["wT"], prep["b"], z_p, prep["bT"])

    return out_p[:M, :out_f].reshape(*lead_shape, out_f)


def cola_linear(x, w_res, bias, a_sum, b_sum, scaling, *,
                tm=256, tn=1024, tk=1024, compute_dtype=jnp.bfloat16,
                out_dtype=None):
    """One-shot convenience wrapper (prefer prepare_cola_weights once at load
    time + cola_linear_prepared per call)."""
    prep = prepare_cola_weights(w_res, bias, a_sum, b_sum, scaling,
                                tn=tn, tk=tk, compute_dtype=compute_dtype)
    return cola_linear_prepared(x, prep, tm=tm, out_dtype=out_dtype)


def pissa_init(w0, r, num_A, num_B, scaling):
    """Reproduce ColaLayer.pissa_init: split W into residual + (num_B*B)(num_A*A)."""
    w0 = np.asarray(w0, dtype=np.float32)
    V, S, Uh = np.linalg.svd(w0, full_matrices=False)
    Vr = V[:, :r]
    Sr = S[:r] / scaling
    Uhr = Uh[:r, :]
    lora_A = (np.diag(np.sqrt(Sr)) @ Uhr) / num_A        # (r, in)
    lora_B = (Vr @ np.diag(np.sqrt(Sr))) / num_B         # (out, r)
    w_res = w0 - scaling * ((lora_B * num_B) @ (lora_A * num_A))
    return jnp.asarray(w_res), jnp.asarray(lora_A), jnp.asarray(lora_B)


if __name__ == "__main__":
    # Small shapes consistent with an nn.Linear base layer (exercises padding:
    # M=16 -> tm=16, in=96/out=80 -> padded to 128, r=4 -> padded to 128).
    batch, seq = 2, 8
    in_features, out_features = 96, 80
    r, num_A, num_B, lora_alpha = 4, 2, 3, 8
    scaling = lora_alpha / r

    key = jax.random.PRNGKey(0)
    kw, kb, kx = jax.random.split(key, 3)

    # Deterministic synthetic base-layer params (kaiming-uniform-like range).
    bound = 1.0 / jnp.sqrt(in_features)
    w0 = jax.random.uniform(kw, (out_features, in_features),
                            minval=-bound, maxval=bound, dtype=jnp.float32)
    bias = jax.random.uniform(kb, (out_features,),
                              minval=-bound, maxval=bound, dtype=jnp.float32)

    # PiSSA initialization (all A_i equal, all B_j equal -> sums are count*weight).
    w_res, lora_A, lora_B = pissa_init(w0, r, num_A, num_B, scaling)
    a_sum = num_A * lora_A        # sum_i A_i   (r, in)
    b_sum = num_B * lora_B        # sum_j B_j   (out, r)

    x = jax.random.normal(kx, (batch, seq, in_features), dtype=jnp.float32)

    # Weights prepared once (load-time), then applied.
    prep = prepare_cola_weights(w_res, bias, a_sum, b_sum, scaling)
    out = cola_linear_prepared(x, prep)
    jax.block_until_ready(out)

    # Pure-JAX f32 reference (mirrors the PyTorch forward loop, dropout == Identity).
    x2d = x.reshape(batch * seq, in_features)
    ref = x2d @ w_res.T + bias[None, :]
    for _i in range(num_A):
        for _j in range(num_B):
            ref = ref + ((x2d @ lora_A.T) @ lora_B.T) * scaling
    ref = ref.reshape(batch, seq, out_features)

    # Loose tolerance accounts for bf16 operands (f32 accumulation in-kernel).
    assert out.shape == ref.shape
    assert jnp.allclose(out, ref, atol=3e-2, rtol=3e-2), "mismatch vs reference"

    # Tight check against a bf16-matched reference (same quantization, f32 accum).
    cd = jnp.bfloat16
    z_bf = jnp.dot(x2d.astype(cd), a_sum.T.astype(cd),
                   preferred_element_type=jnp.float32)
    ref_bf = (jnp.dot(x2d.astype(cd), w_res.T.astype(cd),
                      preferred_element_type=jnp.float32)
              + bias[None, :]
              + jnp.dot(z_bf.astype(cd), (scaling * b_sum.T).astype(cd),
                        preferred_element_type=jnp.float32))
    ref_bf = ref_bf.reshape(batch, seq, out_features)
    assert jnp.allclose(out, ref_bf, atol=2e-3, rtol=2e-3), "mismatch vs bf16 reference"

    # TODO(synk): dropout>0 (stochastic) and mixed-batch `adapter_names` paths are
    # not represented in the kernel; eval-mode single-adapter path only.
    print("KERNEL_OK")
</pallas_src>

<mosaic_0001>
module attributes {stable_mosaic.version = 11 : i64} {
  func.func @_xa_kernel(%arg0: i32, %arg1: i32, %arg2: memref<16x128xbf16, #tpu.memory_space<vmem>>, %arg3: memref<128x128xbf16, #tpu.memory_space<vmem>>, %arg4: memref<16x128xbf16, #tpu.memory_space<vmem>>, %arg5: memref<16x128xf32, #tpu.memory_space<vmem>>) attributes {dimension_semantics = [#tpu.dimension_semantics<parallel>, #tpu.dimension_semantics<arbitrary>], iteration_bounds = array<i64: 1, 1>, scalar_prefetch = 0 : i64, scratch_operands = 1 : i64, tpu.core_type = #tpu.core_type<tc>, window_params = [{transform_indices = @transform_0, window_bounds = array<i64: 16, 128>}, {transform_indices = @transform_1, window_bounds = array<i64: 128, 128>}, {transform_indices = @transform_2, window_bounds = array<i64: 16, 128>}]} {
    %c0_i32 = arith.constant 0 : i32
    %0 = arith.cmpi eq, %arg1, %c0_i32 : i32
    %1 = arith.extui %0 : i1 to i32
    %c0_i32_0 = arith.constant 0 : i32
    %2 = arith.cmpi ne, %1, %c0_i32_0 : i32
    scf.if %2 {
      %cst_10 = arith.constant 0.000000e+00 : f32
      %12 = vector.broadcast %cst_10 : f32 to vector<16x128xf32>
      %c0_11 = arith.constant 0 : index
      %c0_12 = arith.constant 0 : index
      %13 = vector.load %arg5[%c0_11, %c0_12] : memref<16x128xf32, #tpu.memory_space<vmem>>, vector<16x128xf32>
      tpu.vector_store %arg5[%c0_11, %c0_12], %12 {strides = array<i32>} : memref<16x128xf32, #tpu.memory_space<vmem>>, vector<16x128xf32>,
    } else {
    }
    %c0 = arith.constant 0 : index
    %c0_1 = arith.constant 0 : index
    %3 = vector.load %arg5[%c0, %c0_1] : memref<16x128xf32, #tpu.memory_space<vmem>>, vector<16x128xf32>
    %c0_2 = arith.constant 0 : index
    %c0_3 = arith.constant 0 : index
    %4 = vector.load %arg2[%c0_2, %c0_3] : memref<16x128xbf16, #tpu.memory_space<vmem>>, vector<16x128xbf16>
    %c0_4 = arith.constant 0 : index
    %c0_5 = arith.constant 0 : index
    %5 = vector.load %arg3[%c0_4, %c0_5] : memref<128x128xbf16, #tpu.memory_space<vmem>>, vector<128x128xbf16>
    %cst = arith.constant dense<0.000000e+00> : vector<16x128xf32>
    %6 = tpu.matmul %4, %5, %cst {dimension_numbers = #tpu.dot_dimension_numbers<[1], [0], [0], [1], [0, 0, 1, 1], [], []>} : vector<16x128xbf16>, vector<128x128xbf16>, vector<16x128xf32> -> vector<16x128xf32>
    %7 = arith.addf %3, %6 : vector<16x128xf32>
    %c0_6 = arith.constant 0 : index
    %c0_7 = arith.constant 0 : index
    %8 = vector.load %arg5[%c0_6, %c0_7] : memref<16x128xf32, #tpu.memory_space<vmem>>, vector<16x128xf32>
    tpu.vector_store %arg5[%c0_6, %c0_7], %7 {strides = array<i32>} : memref<16x128xf32, #tpu.memory_space<vmem>>, vector<16x128xf32>,
    %c0_i32_8 = arith.constant 0 : i32
    %9 = arith.cmpi eq, %arg1, %c0_i32_8 : i32
    %10 = arith.extui %9 : i1 to i32
    %c0_i32_9 = arith.constant 0 : i32
    %11 = arith.cmpi ne, %10, %c0_i32_9 : i32
    scf.if %11 {
      %c0_10 = arith.constant 0 : index
      %c0_11 = arith.constant 0 : index
      %12 = vector.load %arg5[%c0_10, %c0_11] : memref<16x128xf32, #tpu.memory_space<vmem>>, vector<16x128xf32>
      %13 = arith.truncf %12 : vector<16x128xf32> to vector<16x128xbf16>
      %c0_12 = arith.constant 0 : index
      %c0_13 = arith.constant 0 : index
      %14 = vector.load %arg4[%c0_12, %c0_13] : memref<16x128xbf16, #tpu.memory_space<vmem>>, vector<16x128xbf16>
      tpu.vector_store %arg4[%c0_12, %c0_13], %13 {strides = array<i32>} : memref<16x128xbf16, #tpu.memory_space<vmem>>, vector<16x128xbf16>,
    } else {
    }
    return
  }
  func.func @transform_0(%arg0: i32, %arg1: i32) -> (i32, i32) {
    %c0_i32 = arith.constant 0 : i32
    return %arg0, %arg1 : i32, i32
  }
  func.func @transform_1(%arg0: i32, %arg1: i32) -> (i32, i32) {
    %c0_i32 = arith.constant 0 : i32
    %c0_i32_0 = arith.constant 0 : i32
    return %arg1, %c0_i32 : i32, i32
  }
  func.func @transform_2(%arg0: i32, %arg1: i32) -> (i32, i32) {
    %c0_i32 = arith.constant 0 : i32
    %c0_i32_0 = arith.constant 0 : i32
    return %arg0, %c0_i32 : i32, i32
  }
}

</mosaic_0001>

<bundles_post_ra>
// kernel: tpu_custom_call.1
= control target key start
LH: loop header
LB: loop body
LE: loop exit
PB: predicated region body
PF: predicated region fallthrough
CT: control target
= control target key end

     0   :  { %7 = vsyncpa [#allocation4], 0  ;;  %s401_s0 = inlined_call_operand.hbm [shape: bf16[16,128], index: 0, kind: input, shape index: {}]   ;;  %s402_s1 = inlined_call_operand.hbm [shape: bf16[128,128], index: 1, kind: input, shape index: {}]   ;;  %s403_s2 = inlined_call_operand.hbm [shape: bf16[16,128], index: 2, kind: output, shape index: {}]  }
   0x1   :  { %8 = vsyncpa [#allocation7], 0 }
   0x2   :  { %9 = vsyncpa [#allocation5], 0  ;;  %s334_s9 = smov [#allocation3]   ;;  %s262_s13 = scalar_lea.hbm %s401_s0, 128 }
   0x3   :  { %s15_s10 = sshll.u32 %s334_s9, 4  ;;  %p263_p0 = scmp.ne.s32.totalorder %s401_s0, %s262_s13  ;;  %s16_s10 = int_to_ptr.vmem [resolvable:$true] %s15_s10 }
   0x4   :  { %p266_p1 = scmp.lt.u32.totalorder %s262_s13, %s401_s0 }
   0x6   :  { %p268_p2 = pnand %p266_p1, %p263_p0 }
   0x8   :  { %271 = shalt.err (!%p268_p2)
}
   0x9   :  { %s272_s18 = scalar_lea.vmem %s16_s10, 128  ;;  %p277_p4 = scmp.lt.s32.totalorder %s16_s10, %s16_s10 }
   0xa   :  { %p273_p3 = scmp.ne.s32.totalorder %s16_s10, %s272_s18  ;;  %p278_p5 = scmp.lt.s32.totalorder %s272_s18, %s272_s18 }
   0xc   :  { %p279_p6 = por %p278_p5, %p277_p4 }
   0xe   :  { %p280_p7 = pnand %p279_p6, %p273_p3 }
  0x10   :  { %283 = shalt.err (!%p280_p7)
}
  0x11   :  { %s335_s19 = smov 64   ;;  %s336_s20 = smov 4  }
  0x12   :  { %21 = dma.hbm_to_vmem [thread:$0]  %s401_s0, 128, %s16_s10, [#allocation4], %s335_s19, %s335_s19, %s336_s20  }
  0x13   :  { %s337_s23 = smov [#allocation6]   ;;  %s284_s27 = scalar_lea.hbm %s402_s1, 1024 }
  0x14   :  { %s27_s24 = sshll.u32 %s337_s23, 4  ;;  %p285_p8 = scmp.ne.s32.totalorder %s402_s1, %s284_s27  ;;  %s28_s24 = int_to_ptr.vmem [resolvable:$true] %s27_s24 }
  0x15   :  { %p288_p9 = scmp.lt.u32.totalorder %s284_s27, %s402_s1 }
  0x17   :  { %p290_p10 = pnand %p288_p9, %p285_p8 }
  0x19   :  { %293 = shalt.err (!%p290_p10)
}
  0x1a   :  { %s294_s4 = scalar_lea.vmem %s28_s24, 1024  ;;  %p299_p12 = scmp.lt.s32.totalorder %s28_s24, %s28_s24 }
  0x1b   :  { %p295_p11 = scmp.ne.s32.totalorder %s28_s24, %s294_s4  ;;  %p300_p13 = scmp.lt.s32.totalorder %s294_s4, %s294_s4 }
  0x1d   :  { %p301_p0 = por %p300_p13, %p299_p12 }
  0x1f   :  { %p302_p1 = pnand %p301_p0, %p295_p11 }
  0x21   :  { %305 = shalt.err (!%p302_p1)
}
  0x22   :  { %33 = dma.hbm_to_vmem [thread:$0]  %s402_s1, 1024, %s28_s24, [#allocation7], %s335_s19, %s335_s19, %s336_s20  }
  0x23   :  { %328 = dma.done.wait [#allocation4], 128  }
  0x24   :  { %329 = vsyncadd [#allocation4], 4294967168 }
  0x25   :  { %330 = dma.done.wait [#allocation7], 1024  }
  0x26   :  { %331 = vsyncadd [#allocation7], 4294966272  ;;  %v338_v0 = vmov 0.0   ;;  %vm339_vm0 = vmmov 0   ;;  %v253_v1 = vld [vmem:[#allocation6] sm:$0xff]   ;;  %v254_v2 = vld [vmem:[#allocation6 + $0x8] sm:$0xff]  }
  0x27   :  { %226 = vmatprep.subr.bf16.mxu0 %v338_v0  ;;  %242 = vmatprep.mubr.msk.bf16.mxu0 %vm339_vm0, %v338_v0  ;;  %v255_v3 = vld [vmem:[#allocation6 + $0x10] sm:$0xff]   ;;  %v256_v4 = vld [vmem:[#allocation6 + $0x18] sm:$0xff]   ;;  %v257_v5 = vld [vmem:[#allocation6 + $0x20] sm:$0xff]   ;;  %s340_s1 = smov [#allocation8]  }
  0x28   :  { %227 = vmatpush3.bf16.msra.mxu0 %v253_v1  ;;  %v258_v6 = vld [vmem:[#allocation6 + $0x28] sm:$0xff]   ;;  %v259_v7 = vld [vmem:[#allocation6 + $0x30] sm:$0xff]   ;;  %v260_v8 = vld [vmem:[#allocation6 + $0x38] sm:$0xff]   ;;  %s186_s6 = sshll.u32 %s340_s1, 4  ;;  %s187_s6 = int_to_ptr.vmem [resolvable:$true] %s186_s6 }
  0x29   :  { %228 = vmatprep.subr.bf16.mxu0 %v338_v0  ;;  %v261_v9 = vld [vmem:[#allocation3] sm:$0xff]   ;;  %s306_s7 = scalar_lea.vmem %s187_s6, 128  ;;  %p311_p3 = scmp.lt.s32.totalorder %s187_s6, %s187_s6 }
  0x2a   :  { %p307_p2 = scmp.ne.s32.totalorder %s187_s6, %s306_s7  ;;  %p312_p4 = scmp.lt.s32.totalorder %s306_s7, %s306_s7 }
  0x2c   :  { %229 = vmatpush3.bf16.msra.mxu0 %v254_v2  ;;  %p313_p5 = por %p312_p4, %p311_p3 }
  0x2d   :  { %230 = vmatprep.subr.bf16.mxu0 %v338_v0 }
  0x2e   :  { %p314_p6 = pnand %p313_p5, %p307_p2 }
  0x30   :  { %231 = vmatpush3.bf16.msra.mxu0 %v255_v3 }
  0x31   :  { %232 = vmatprep.subr.bf16.mxu0 %v338_v0 }
  0x34   :  { %233 = vmatpush3.bf16.msra.mxu0 %v256_v4 }
  0x35   :  { %234 = vmatprep.subr.bf16.mxu0 %v338_v0 }
  0x38   :  { %235 = vmatpush3.bf16.msra.mxu0 %v257_v5 }
  0x39   :  { %236 = vmatprep.subr.bf16.mxu0 %v338_v0 }
  0x3c   :  { %237 = vmatpush3.bf16.msra.mxu0 %v258_v6 }
  0x3d   :  { %238 = vmatprep.subr.bf16.mxu0 %v338_v0 }
  0x40   :  { %239 = vmatpush3.bf16.msra.mxu0 %v259_v7 }
  0x41   :  { %240 = vmatprep.subr.bf16.mxu0 %v338_v0 }
  0x44   :  { %241 = vmatpush3.bf16.msra.mxu0 %v260_v8 }
  0x47   :  { %243 = vmatmul.mubr.bf16.vlgmr.msra.gmra.mrb[0].mxu0 %v261_v9 }
 0x11a   :  { %v155_v10 = vpop.f32.mrb[0].mxu0 }
 0x11b   :  { %v244_v11 = vpop.f32.mrb[1].mxu0 }
 0x11c   :  { %v158_v12 = vpop.f32.mrb[2].mxu0 }
 0x11d   :  { %v215_v13 = vpack.c.bf16 %v158_v12, %v155_v10  ;;  %v245_v14 = vpop.f32.mrb[3].mxu0 }
 0x11f   :  { %216 = vst [vmem:[#allocation8] sm:$0xff] %v215_v13  }
 0x120   :  { %317 = shalt.err (!%p314_p6)
}
 0x121   :  { %s318_s10 = scalar_lea.hbm %s403_s2, 128 }
 0x122   :  { %p319_p7 = scmp.ne.s32.totalorder %s403_s2, %s318_s10  ;;  %p322_p8 = scmp.lt.u32.totalorder %s318_s10, %s403_s2 }
 0x124   :  { %p324_p9 = pnand %p322_p8, %p319_p7 }
 0x126   :  { %327 = shalt.err (!%p324_p9)
}
 0x127   :  { %192 = dma.vmem_to_hbm [thread:$0]  %s187_s6, 128, %s403_s2, [#allocation5], %s335_s19, %s335_s19, %s336_s20  }
 0x128   :  { %332 = dma.done.wait [#allocation5], 128  }
 0x129   :  { %333 = vsyncadd [#allocation5], 4294967168 }
 0x12a   :  { %196 = vsyncpa [#allocation4], 1 }
 0x12b   :  { %197 = vsyncpa [#allocation7], 1 }
 0x12c   :  { %198 = vsyncpa [#allocation5], 1 }

</bundles_post_ra>
